<compile_context>
chip_gen: v5e
topology: v5e:2x2
jax: 0.10.0
libtpu: 0.0.40
codegen_flags: <defaults>
</compile_context>

<pallas_src>
import functools

import jax
import jax.numpy as jnp
from jax.experimental import pallas as pl
from jax.experimental.pallas import tpu as pltpu

LN_EPS = 1e-5


def _round_up(a, m):
    return (a + m - 1) // m * m


def _cdiv(a, b):
    return (a + b - 1) // b


def _layernorm_f32(y, gamma, beta):
    # y: (tm, d_model) f32 ; gamma/beta: (1, d_model) f32
    mu = jnp.mean(y, axis=-1, keepdims=True)
    yc = y - mu
    var = jnp.mean(yc * yc, axis=-1, keepdims=True)
    inv = jax.lax.rsqrt(var + LN_EPS)
    return yc * inv * gamma + beta


# ----------------------------------------------------------------------------
# Kernels
# ----------------------------------------------------------------------------
def _ffn_kernel_resident(x_ref, w1_ref, b1_ref, w2_ref, b2_ref, g_ref, be_ref,
                         o_ref, *, pre_lnorm, mxu_dtype, precision):
    """Weights fully resident in VMEM: one grid axis over row tiles only."""
    x = x_ref[...]
    x32 = x.astype(jnp.float32)
    g32 = g_ref[...].astype(jnp.float32)
    be32 = be_ref[...].astype(jnp.float32)

    if pre_lnorm:
        lhs = _layernorm_f32(x32, g32, be32).astype(mxu_dtype)
    else:
        lhs = x.astype(mxu_dtype)

    h = jnp.dot(lhs, w1_ref[...].astype(mxu_dtype),
                preferred_element_type=jnp.float32, precision=precision)
    h = jnp.maximum(h + b1_ref[...].astype(jnp.float32), 0.0)
    core = jnp.dot(h.astype(mxu_dtype), w2_ref[...].astype(mxu_dtype),
                   preferred_element_type=jnp.float32, precision=precision)
    core = core + b2_ref[...].astype(jnp.float32)

    if pre_lnorm:
        out = jnp.maximum(core, 0.0) + x32
    else:
        out = _layernorm_f32(x32 + core, g32, be32)
    o_ref[...] = out.astype(o_ref.dtype)


def _ffn_kernel_ksplit(x_ref, w1_ref, b1_ref, w2_ref, b2_ref, g_ref, be_ref,
                       o_ref, *scratch, pre_lnorm, acc_in_out, mxu_dtype,
                       precision):
    """Streaming k-slabs of d_inner; grid = (row tiles, d_inner // tk)."""
    si = 0
    if acc_in_out:
        acc_ref = o_ref          # output block is f32 and resident across k
    else:
        acc_ref = scratch[si]
        si += 1
    ln_ref = scratch[si] if pre_lnorm else None

    k = pl.program_id(1)
    nk = pl.num_programs(1)

    @pl.when(k == 0)
    def _init():
        acc_ref[...] = jnp.zeros_like(acc_ref)
        if pre_lnorm:
            xn = _layernorm_f32(x_ref[...].astype(jnp.float32),
                                g_ref[...].astype(jnp.float32),
                                be_ref[...].astype(jnp.float32))
            ln_ref[...] = xn.astype(ln_ref.dtype)   # LN(x) computed once per tile

    if pre_lnorm:
        lhs = ln_ref[...].astype(mxu_dtype)
    else:
        lhs = x_ref[...].astype(mxu_dtype)

    # (tm, d_model) @ (d_model, tk) -> f32 on the MXU.
    h = jnp.dot(lhs, w1_ref[...].astype(mxu_dtype),
                preferred_element_type=jnp.float32, precision=precision)
    h = jnp.maximum(h + b1_ref[...].astype(jnp.float32), 0.0)
    # (tm, tk) @ (tk, d_model) -> f32, accumulated across k.
    contrib = jnp.dot(h.astype(mxu_dtype), w2_ref[...].astype(mxu_dtype),
                      preferred_element_type=jnp.float32, precision=precision)
    acc_ref[...] += contrib.astype(acc_ref.dtype)

    @pl.when(k == nk - 1)
    def _finalize():
        x32 = x_ref[...].astype(jnp.float32)
        g32 = g_ref[...].astype(jnp.float32)
        be32 = be_ref[...].astype(jnp.float32)
        core = acc_ref[...].astype(jnp.float32) + b2_ref[...].astype(jnp.float32)
        if pre_lnorm:
            out = jnp.maximum(core, 0.0) + x32
        else:
            out = _layernorm_f32(x32 + core, g32, be32)
        o_ref[...] = out.astype(o_ref.dtype)


# ----------------------------------------------------------------------------
# Tiling / VMEM budgeting
# ----------------------------------------------------------------------------
def _vmem_budget_bytes():
    cap = 128 * 1024 * 1024
    try:
        info = pltpu.get_tpu_info()
        c = getattr(info, "vmem_capacity_bytes", None)
        if c:
            cap = int(c)
    except Exception:
        pass
    # Leave headroom for Mosaic internal scratch / pipelining slack.
    # Critical on v7x where physical VMEM per TensorCore is only 64 MiB.
    return int(cap * 0.8)


def _vmem_estimate(tm, tk, d_model, isx, isw, mxu_isz,
                   pre_lnorm, acc_in_out, resident):
    est = 2 * tm * d_model * isx * 2                  # x + out tiles (dbl-buffered)
    est += 2 * (d_model * tk + tk * d_model) * isw    # W1/W2 (dbl-buffered)
    est += 2 * tk * 4 + 8 * d_model * 4               # b1 slab + b2/gamma/beta
    if not resident:
        if not acc_in_out:
            est += tm * d_model * 4                   # f32 accumulator scratch
        if pre_lnorm:
            est += tm * d_model * mxu_isz             # cached LN(x)
    # intermediates: h in f32 + cast copy, f32 copies of the x tile
    est += tm * tk * (4 + mxu_isz) + 2 * tm * d_model * 4
    return est


def _choose_tiling(n, d_model, d_inner, isx, isw, mxu_isz, pre_lnorm,
                   acc_in_out, tm_req, tk_req, vmem_budget):
    # Sub-32-bit dtypes pack 16 rows per vreg -> round tm to 16, else 8.
    gran = 8 if isx >= 4 else 16
    tm = max(gran, min(_round_up(tm_req, gran), _round_up(n, gran)))
    # Give the second TensorCore work on v7x: at least 2 row tiles when possible.
    if _cdiv(n, tm) < 2 and n > gran:
        tm = max(gran, _round_up(_cdiv(n, 2), gran))

    def fits(tm_c, tk_c, resident):
        return _vmem_estimate(tm_c, tk_c, d_model, isx, isw, mxu_isz,
                              pre_lnorm, acc_in_out, resident) <= vmem_budget

    # Explicit tk override (must divide d_inner); shrink tm if it doesn't fit.
    if tk_req is not None and 0 < tk_req <= d_inner and d_inner % tk_req == 0:
        tm_c = tm
        while tm_c > gran and not fits(tm_c, tk_req, tk_req == d_inner):
            tm_c = max(gran, _round_up(tm_c // 2, gran))
        return tm_c, tk_req

    # Preferred: keep W1/W2 fully resident in VMEM (weights read from HBM once).
    tm_c = tm
    while True:
        if fits(tm_c, d_inner, True):
            return tm_c, d_inner
        if tm_c <= max(gran, 128):
            break
        tm_c = max(gran, _round_up(tm_c // 2, gran))

    # Weights too large for VMEM: stream the largest 128-multiple divisor of
    # d_inner that fits, keeping the row tile as large as the budget allows.
    cands = [c for c in range((d_inner // 128) * 128, 0, -128)
             if c > 0 and d_inner % c == 0]
    if not cands:
        cands = [d_inner]
    tm_c = tm
    while True:
        for tk_c in cands:
            if fits(tm_c, tk_c, tk_c == d_inner):
                return tm_c, tk_c
        if tm_c <= gran:
            return gran, cands[-1]
        tm_c = max(gran, _round_up(tm_c // 2, gran))


# ----------------------------------------------------------------------------
# Wrapper
# ----------------------------------------------------------------------------
def positionwise_ff(x, w1, b1, w2, b2, gamma, beta, *, pre_lnorm=False,
                    tm=512, tk=None, use_bf16_matmul=False, precision=None):
    """x: (..., d_model). Returns same shape/dtype as x."""
    orig_shape = x.shape
    d_model = orig_shape[-1]
    d_inner = w1.shape[1]
    x2 = x.reshape(-1, d_model)
    n = x2.shape[0]
    out_dtype = x.dtype

    if use_bf16_matmul or x.dtype == jnp.bfloat16 or w1.dtype == jnp.bfloat16:
        mxu_dtype = jnp.bfloat16
    else:
        mxu_dtype = jnp.float32

    isx = jnp.dtype(x.dtype).itemsize
    isw = jnp.dtype(w1.dtype).itemsize
    mxu_isz = jnp.dtype(mxu_dtype).itemsize

    # When the output is f32 the output block (resident across k) doubles as the
    # f32 accumulator -> no extra scratch (VMEM headroom on v7x).
    acc_in_out = (out_dtype == jnp.float32)

    vmem_budget = _vmem_budget_bytes()
    tm_sel, tk_sel = _choose_tiling(n, d_model, d_inner, isx, isw, mxu_isz,
                                    pre_lnorm, acc_in_out, tm, tk, vmem_budget)

    n_pad = _round_up(n, tm_sel)
    if n_pad != n:
        x2 = jnp.pad(x2, ((0, n_pad - n), (0, 0)))

    b1_2 = b1.reshape(1, d_inner)
    b2_2 = b2.reshape(1, d_model)
    g_2 = gamma.reshape(1, d_model)
    be_2 = beta.reshape(1, d_model)

    n_row_tiles = n_pad // tm_sel
    resident = (tk_sel == d_inner)
    nk = d_inner // tk_sel

    nbytes = lambda a: a.size * a.dtype.itemsize
    w_bytes = nbytes(w1) + nbytes(w2)
    cost = pl.CostEstimate(
        flops=4 * n_pad * d_model * d_inner,          # two matmuls
        transcendentals=n_pad,                        # one rsqrt per row (LN)
        bytes_accessed=(2 * n_pad * d_model * isx
                        + (w_bytes if resident else w_bytes * n_row_tiles)
                        + nbytes(b1) + nbytes(b2) + nbytes(gamma) + nbytes(beta)),
    )

    if resident:
        kernel = functools.partial(_ffn_kernel_resident, pre_lnorm=pre_lnorm,
                                   mxu_dtype=mxu_dtype, precision=precision)
        grid_spec = pltpu.PrefetchScalarGridSpec(
            num_scalar_prefetch=0,
            grid=(n_row_tiles,),
            in_specs=[
                pl.BlockSpec((tm_sel, d_model), lambda i: (i, 0)),    # x tile
                pl.BlockSpec((d_model, d_inner), lambda i: (0, 0)),   # W1 (resident)
                pl.BlockSpec((1, d_inner), lambda i: (0, 0)),         # b1
                pl.BlockSpec((d_inner, d_model), lambda i: (0, 0)),   # W2 (resident)
                pl.BlockSpec((1, d_model), lambda i: (0, 0)),         # b2
                pl.BlockSpec((1, d_model), lambda i: (0, 0)),         # gamma
                pl.BlockSpec((1, d_model), lambda i: (0, 0)),         # beta
            ],
            out_specs=pl.BlockSpec((tm_sel, d_model), lambda i: (i, 0)),
            scratch_shapes=(),
        )
        dim_sem = ("parallel",)
    else:
        kernel = functools.partial(_ffn_kernel_ksplit, pre_lnorm=pre_lnorm,
                                   acc_in_out=acc_in_out, mxu_dtype=mxu_dtype,
                                   precision=precision)
        scratch = []
        if not acc_in_out:
            scratch.append(pltpu.VMEM((tm_sel, d_model), jnp.float32))
        if pre_lnorm:
            scratch.append(pltpu.VMEM((tm_sel, d_model), mxu_dtype))
        grid_spec = pltpu.PrefetchScalarGridSpec(
            num_scalar_prefetch=0,
            grid=(n_row_tiles, nk),
            in_specs=[
                pl.BlockSpec((tm_sel, d_model), lambda i, k: (i, 0)),  # x tile
                pl.BlockSpec((d_model, tk_sel), lambda i, k: (0, k)),  # W1 k-slab
                pl.BlockSpec((1, tk_sel), lambda i, k: (0, k)),        # b1 k-slab
                pl.BlockSpec((tk_sel, d_model), lambda i, k: (k, 0)),  # W2 k-slab
                pl.BlockSpec((1, d_model), lambda i, k: (0, 0)),       # b2
                pl.BlockSpec((1, d_model), lambda i, k: (0, 0)),       # gamma
                pl.BlockSpec((1, d_model), lambda i, k: (0, 0)),       # beta
            ],
            out_specs=pl.BlockSpec((tm_sel, d_model), lambda i, k: (i, 0)),
            scratch_shapes=tuple(scratch),
        )
        dim_sem = ("parallel", "arbitrary")

    out = pl.pallas_call(
        kernel,
        out_shape=jax.ShapeDtypeStruct((n_pad, d_model), out_dtype),
        grid_spec=grid_spec,
        compiler_params=pltpu.CompilerParams(
            dimension_semantics=dim_sem,
            vmem_limit_bytes=vmem_budget),
        cost_estimate=cost,
    )(x2, w1, b1_2, w2, b2_2, g_2, be_2)

    return out[:n].reshape(orig_shape)


# ----------------------------------------------------------------------------
# Reference + test
# ----------------------------------------------------------------------------
def _reference(x, w1, b1, w2, b2, gamma, beta, pre_lnorm):
    # Pure-f32 reference of the module's math (matches the PyTorch spec,
    # including the F.relu(core_out) in the pre_lnorm branch).
    x, w1, b1, w2, b2, gamma, beta = (
        a.astype(jnp.float32) for a in (x, w1, b1, w2, b2, gamma, beta))

    def ln(y):
        mu = jnp.mean(y, axis=-1, keepdims=True)
        var = jnp.mean((y - mu) ** 2, axis=-1, keepdims=True)
        return (y - mu) / jnp.sqrt(var + LN_EPS) * gamma + beta

    if pre_lnorm:
        core = jnp.maximum(ln(x) @ w1 + b1, 0.0) @ w2 + b2
        return jnp.maximum(core, 0.0) + x
    core = jnp.maximum(x @ w1 + b1, 0.0) @ w2 + b2
    return ln(x + core)


if __name__ == "__main__":
    # Small but lane-dense shapes (d_model, d_inner multiples of 128).
    seq, batch, d_model, d_inner = 8, 4, 128, 256

    key = jax.random.PRNGKey(0)
    k_x, k_w1, k_b1, k_w2, k_b2 = jax.random.split(key, 5)

    x = jax.random.normal(k_x, (seq, batch, d_model), dtype=jnp.float32)
    w1 = jax.random.normal(k_w1, (d_model, d_inner), dtype=jnp.float32) * 0.05
    b1 = jax.random.normal(k_b1, (d_inner,), dtype=jnp.float32) * 0.05
    w2 = jax.random.normal(k_w2, (d_inner, d_model), dtype=jnp.float32) * 0.05
    b2 = jax.random.normal(k_b2, (d_model,), dtype=jnp.float32) * 0.05
    gamma = jnp.ones((d_model,), dtype=jnp.float32)
    beta = jnp.zeros((d_model,), dtype=jnp.float32)

    ok = True

    # f32: resident-weight path (tk=None -> auto) and forced k-slab streaming
    # path (tk=128 -> 2 k steps, exercises accumulate-in-output + LN caching).
    for pre_lnorm in (False, True):
        for tk_override in (None, 128):
            out = positionwise_ff(x, w1, b1, w2, b2, gamma, beta,
                                  pre_lnorm=pre_lnorm, tk=tk_override)
            jax.block_until_ready(out)
            ref = _reference(x, w1, b1, w2, b2, gamma, beta, pre_lnorm)
            err = float(jnp.max(jnp.abs(out.astype(jnp.float32) - ref)))
            if err > 5e-4:
                ok = False
                print(f"mismatch f32 pre_lnorm={pre_lnorm} tk={tk_override} "
                      f"max_abs_err={err}")

    # bf16 (native MXU dtype): resident and streaming (exercises the f32 acc
    # scratch + bf16 LN cache). Looser tolerance vs f32 math on the same
    # bf16-quantized inputs.
    bf = jnp.bfloat16
    xb, w1b, b1b, w2b, b2b = (a.astype(bf) for a in (x, w1, b1, w2, b2))
    gb, beb = gamma.astype(bf), beta.astype(bf)
    for pre_lnorm in (False, True):
        for tk_override in (None, 128):
            out_bf = positionwise_ff(xb, w1b, b1b, w2b, b2b, gb, beb,
                                     pre_lnorm=pre_lnorm, tk=tk_override)
            jax.block_until_ready(out_bf)
            ref_bf = _reference(xb, w1b, b1b, w2b, b2b, gb, beb, pre_lnorm)
            err_bf = float(jnp.max(jnp.abs(out_bf.astype(jnp.float32) - ref_bf)))
            if not bool(jnp.isfinite(err_bf)) or err_bf > 0.08:
                ok = False
                print(f"mismatch bf16 pre_lnorm={pre_lnorm} tk={tk_override} "
                      f"max_abs_err={err_bf}")

    if ok:
        print("KERNEL_OK")
</pallas_src>

<mosaic_0001>
module attributes {stable_mosaic.version = 11 : i64} {
  func.func @_ffn_kernel_resident(%arg0: i32, %arg1: memref<16x128xf32, #tpu.memory_space<vmem>>, %arg2: memref<128x256xf32, #tpu.memory_space<vmem>>, %arg3: memref<1x256xf32, #tpu.memory_space<vmem>>, %arg4: memref<256x128xf32, #tpu.memory_space<vmem>>, %arg5: memref<1x128xf32, #tpu.memory_space<vmem>>, %arg6: memref<1x128xf32, #tpu.memory_space<vmem>>, %arg7: memref<1x128xf32, #tpu.memory_space<vmem>>, %arg8: memref<16x128xf32, #tpu.memory_space<vmem>>) attributes {dimension_semantics = [#tpu.dimension_semantics<parallel>], iteration_bounds = array<i64: 2>, scalar_prefetch = 0 : i64, scratch_operands = 0 : i64, tpu.core_type = #tpu.core_type<tc>, window_params = [{transform_indices = @transform_0, window_bounds = array<i64: 16, 128>}, {pipeline_mode = #tpu.pipeline_mode<synchronous>, transform_indices = @transform_1, window_bounds = array<i64: 128, 256>}, {pipeline_mode = #tpu.pipeline_mode<synchronous>, transform_indices = @transform_2, window_bounds = array<i64: 1, 256>}, {pipeline_mode = #tpu.pipeline_mode<synchronous>, transform_indices = @transform_3, window_bounds = array<i64: 256, 128>}, {pipeline_mode = #tpu.pipeline_mode<synchronous>, transform_indices = @transform_4, window_bounds = array<i64: 1, 128>}, {pipeline_mode = #tpu.pipeline_mode<synchronous>, transform_indices = @transform_5, window_bounds = array<i64: 1, 128>}, {pipeline_mode = #tpu.pipeline_mode<synchronous>, transform_indices = @transform_6, window_bounds = array<i64: 1, 128>}, {transform_indices = @transform_7, window_bounds = array<i64: 16, 128>}]} {
    %c0 = arith.constant 0 : index
    %c0_0 = arith.constant 0 : index
    %0 = vector.load %arg1[%c0, %c0_0] : memref<16x128xf32, #tpu.memory_space<vmem>>, vector<16x128xf32>
    %c0_1 = arith.constant 0 : index
    %c0_2 = arith.constant 0 : index
    %1 = vector.load %arg6[%c0_1, %c0_2] : memref<1x128xf32, #tpu.memory_space<vmem>>, vector<1x128xf32>
    %c0_3 = arith.constant 0 : index
    %c0_4 = arith.constant 0 : index
    %2 = vector.load %arg7[%c0_3, %c0_4] : memref<1x128xf32, #tpu.memory_space<vmem>>, vector<1x128xf32>
    %c0_5 = arith.constant 0 : index
    %c0_6 = arith.constant 0 : index
    %3 = vector.load %arg2[%c0_5, %c0_6] : memref<128x256xf32, #tpu.memory_space<vmem>>, vector<128x256xf32>
    %cst = arith.constant dense<0.000000e+00> : vector<16x256xf32>
    %4 = tpu.matmul %0, %3, %cst {dimension_numbers = #tpu.dot_dimension_numbers<[1], [0], [0], [1], [0, 0, 1, 1], [], []>} : vector<16x128xf32>, vector<128x256xf32>, vector<16x256xf32> -> vector<16x256xf32>
    %c0_7 = arith.constant 0 : index
    %c0_8 = arith.constant 0 : index
    %5 = vector.load %arg3[%c0_7, %c0_8] : memref<1x256xf32, #tpu.memory_space<vmem>>, vector<1x256xf32>
    %6 = vector.broadcast %5 : vector<1x256xf32> to vector<16x256xf32>
    %7 = arith.addf %4, %6 : vector<16x256xf32>
    %cst_9 = arith.constant 0.000000e+00 : f32
    %8 = vector.broadcast %cst_9 : f32 to vector<16x256xf32>
    %9 = arith.maximumf %7, %8 : vector<16x256xf32>
    %c0_10 = arith.constant 0 : index
    %c0_11 = arith.constant 0 : index
    %10 = vector.load %arg4[%c0_10, %c0_11] : memref<256x128xf32, #tpu.memory_space<vmem>>, vector<256x128xf32>
    %cst_12 = arith.constant dense<0.000000e+00> : vector<16x128xf32>
    %11 = tpu.matmul %9, %10, %cst_12 {dimension_numbers = #tpu.dot_dimension_numbers<[1], [0], [0], [1], [0, 0, 1, 1], [], []>} : vector<16x256xf32>, vector<256x128xf32>, vector<16x128xf32> -> vector<16x128xf32>
    %c0_13 = arith.constant 0 : index
    %c0_14 = arith.constant 0 : index
    %12 = vector.load %arg5[%c0_13, %c0_14] : memref<1x128xf32, #tpu.memory_space<vmem>>, vector<1x128xf32>
    %13 = vector.broadcast %12 : vector<1x128xf32> to vector<16x128xf32>
    %14 = arith.addf %11, %13 : vector<16x128xf32>
    %15 = arith.addf %0, %14 : vector<16x128xf32>
    %cst_15 = arith.constant dense<0.000000e+00> : vector<16xf32>
    %16 = vector.multi_reduction <add>, %15, %cst_15 [1] : vector<16x128xf32> to vector<16xf32>
    %17 = vector.shape_cast %16 : vector<16xf32> to vector<16x1xf32>
    %cst_16 = arith.constant 1.280000e+02 : f32
    %18 = vector.broadcast %cst_16 : f32 to vector<16x1xf32>
    %19 = arith.divf %17, %18 : vector<16x1xf32>
    %20 = vector.broadcast %19 : vector<16x1xf32> to vector<16x128xf32>
    %21 = arith.subf %15, %20 : vector<16x128xf32>
    %22 = arith.mulf %21, %21 : vector<16x128xf32>
    %cst_17 = arith.constant dense<0.000000e+00> : vector<16xf32>
    %23 = vector.multi_reduction <add>, %22, %cst_17 [1] : vector<16x128xf32> to vector<16xf32>
    %24 = vector.shape_cast %23 : vector<16xf32> to vector<16x1xf32>
    %cst_18 = arith.constant 1.280000e+02 : f32
    %25 = vector.broadcast %cst_18 : f32 to vector<16x1xf32>
    %26 = arith.divf %24, %25 : vector<16x1xf32>
    %cst_19 = arith.constant 9.99999974E-6 : f32
    %27 = vector.broadcast %cst_19 : f32 to vector<16x1xf32>
    %28 = arith.addf %26, %27 : vector<16x1xf32>
    %29 = math.rsqrt %28 : vector<16x1xf32>
    %30 = vector.broadcast %29 : vector<16x1xf32> to vector<16x128xf32>
    %31 = arith.mulf %21, %30 : vector<16x128xf32>
    %32 = vector.broadcast %1 : vector<1x128xf32> to vector<16x128xf32>
    %33 = arith.mulf %31, %32 : vector<16x128xf32>
    %34 = vector.broadcast %2 : vector<1x128xf32> to vector<16x128xf32>
    %35 = arith.addf %33, %34 : vector<16x128xf32>
    %c0_20 = arith.constant 0 : index
    %c0_21 = arith.constant 0 : index
    %36 = vector.load %arg8[%c0_20, %c0_21] : memref<16x128xf32, #tpu.memory_space<vmem>>, vector<16x128xf32>
    tpu.vector_store %arg8[%c0_20, %c0_21], %35 {strides = array<i32>} : memref<16x128xf32, #tpu.memory_space<vmem>>, vector<16x128xf32>,
    return
  }
  func.func @transform_0(%arg0: i32) -> (i32, i32) {
    %c0_i32 = arith.constant 0 : i32
    %c0_i32_0 = arith.constant 0 : i32
    return %arg0, %c0_i32 : i32, i32
  }
  func.func @transform_1(%arg0: i32) -> (i32, i32) {
    %c0_i32 = arith.constant 0 : i32
    %c0_i32_0 = arith.constant 0 : i32
    %c0_i32_1 = arith.constant 0 : i32
    return %c0_i32, %c0_i32_0 : i32, i32
  }
  func.func @transform_2(%arg0: i32) -> (i32, i32) {
    %c0_i32 = arith.constant 0 : i32
    %c0_i32_0 = arith.constant 0 : i32
    %c0_i32_1 = arith.constant 0 : i32
    return %c0_i32, %c0_i32_0 : i32, i32
  }
  func.func @transform_3(%arg0: i32) -> (i32, i32) {
    %c0_i32 = arith.constant 0 : i32
    %c0_i32_0 = arith.constant 0 : i32
    %c0_i32_1 = arith.constant 0 : i32
    return %c0_i32, %c0_i32_0 : i32, i32
  }
  func.func @transform_4(%arg0: i32) -> (i32, i32) {
    %c0_i32 = arith.constant 0 : i32
    %c0_i32_0 = arith.constant 0 : i32
    %c0_i32_1 = arith.constant 0 : i32
    return %c0_i32, %c0_i32_0 : i32, i32
  }
  func.func @transform_5(%arg0: i32) -> (i32, i32) {
    %c0_i32 = arith.constant 0 : i32
    %c0_i32_0 = arith.constant 0 : i32
    %c0_i32_1 = arith.constant 0 : i32
    return %c0_i32, %c0_i32_0 : i32, i32
  }
  func.func @transform_6(%arg0: i32) -> (i32, i32) {
    %c0_i32 = arith.constant 0 : i32
    %c0_i32_0 = arith.constant 0 : i32
    %c0_i32_1 = arith.constant 0 : i32
    return %c0_i32, %c0_i32_0 : i32, i32
  }
  func.func @transform_7(%arg0: i32) -> (i32, i32) {
    %c0_i32 = arith.constant 0 : i32
    %c0_i32_0 = arith.constant 0 : i32
    return %arg0, %c0_i32 : i32, i32
  }
}

</mosaic_0001>

<bundles_post_ra>
// kernel: tpu_custom_call.1
= control target key start
LH: loop header
LB: loop body
LE: loop exit
PB: predicated region body
PF: predicated region fallthrough
CT: control target
= control target key end

     0   :  { %s1244_s0 = inlined_call_operand.hbm [shape: f32[32,128], index: 0, kind: input, shape index: {}]   ;;  %s1245_s1 = inlined_call_operand.hbm [shape: f32[128,256], index: 1, kind: input, shape index: {}]   ;;  %s1246_s2 = inlined_call_operand.hbm [shape: f32[1,256], index: 2, kind: input, shape index: {}]   ;;  %s1247_s3 = inlined_call_operand.hbm [shape: f32[256,128], index: 3, kind: input, shape index: {}]   ;;  %s1248_s4 = inlined_call_operand.vmem [shape: f32[1,128], index: 4, kind: input, shape index: {}]   ;;  %s1249_s5 = inlined_call_operand.vmem [shape: f32[1,128], index: 5, kind: input, shape index: {}]   ;;  %s1250_s6 = inlined_call_operand.vmem [shape: f32[1,128], index: 6, kind: input, shape index: {}]   ;;  %s1251_s7 = inlined_call_operand.hbm [shape: f32[32,128], index: 7, kind: output, shape index: {}]  }
   0x1   :  { %1254 = sst [smem:[#allocation15_spill]] %s1245_s1 }
   0x2   :  { %12 = vsyncpa [#allocation3], 0 }
   0x3   :  { %14 = vsyncpa [#allocation3 + $0x1], 0 }
   0x4   :  { %15 = vsyncpa [#allocation6], 0 }
   0x5   :  { %16 = vsyncpa [#allocation9], 0 }
   0x6   :  { %17 = vsyncpa [#allocation4], 0 }
   0x7   :  { %19 = vsyncpa [#allocation4 + $0x1], 0  ;;  %s1063_s24 = smov 0   ;;  %s1065_s25 = smov 0  }
   0x8   :  { %s1067_s26 = smov 0   ;;  %s1069_s27 = smov 0  }
   0x9 LB: > { %s1084_s28 = sadd.s32 4294967295, %s1011_s27   ;;  %s702_s29 = sadd.s32 4294967294, %s1011_s27   ;;  %s1011_s27 = sphi %s1069_s27, %s1268_s27   ;;  %s1007_s26 = sphi %s1067_s26, %s1267_s26   ;;  %s1003_s25 = sphi %s1065_s25, %s1266_s25   ;;  %s999_s24 = sphi %s1063_s24, %s1265_s24  }
   0xa   : > { %p45_p0 = scmp.ne.s32.totalorder %s1003_s25, %s999_s24  ;;  %p46_p1 = scmp.eq.s32.totalorder %s1084_s28, 0 }
   0xb   : > { %p195_p2 = scmp.eq.s32.totalorder %s1084_s28, 1  ;;  %p201_p3 = scmp.eq.s32.totalorder %s702_s29, 1 }
   0xc   : > { %p1093_p4 = por %p46_p1, %p45_p0  ;;  %p703_p5 = scmp.ge.s32.totalorder %s1011_s27, 1 }
   0xd   : > { %p1098_p6 = por %p201_p3, %p45_p0  ;;  %p208_p7 = scmp.lt.s32.totalorder %s1011_s27, 3 }
   0xe   : > { %s1257_s1 = sld [smem:[#allocation15_spill]]  ;;  %s1013_s13 = smov [#allocation5]  }
   0xf   : > { %p1106_p8 = pnand %p703_p5, %p208_p7  ;;  %s221_s14 = sshll.u32 %s1013_s13, 4  ;;  %s222_s14 = int_to_ptr.vmem [resolvable:$true] %s221_s14 }
  0x10   : > { %s234_s18 = sshll.u32 %s1246_s2, 4  ;;  %s1014_s19 = smov 256   ;;  %s235_s18 = int_to_ptr.hbm [resolvable:$true] %s234_s18 }
  0x11   : > { %p740_p9 = pneg %p1106_p8  ;;  %s1015_s20 = smov 16  }
  0x12   : > { %s1016_s21 = smov [#allocation7]   ;;  %s245_s9 = sshll.u32 %s1247_s3, 4  ;;  %s246_s9 = int_to_ptr.hbm [resolvable:$true] %s245_s9 }
  0x13   : > { %p1114_p10 = pnand %p740_p9, %p46_p1  ;;  %s236_s22 = sshll.u32 %s1016_s21, 4  ;;  %s237_s22 = int_to_ptr.vmem [resolvable:$true] %s236_s22 }
  0x14   : > { %s219_s11 = sshll.u32 %s1257_s1, 4  ;;  %s1017_s10 = smov [#allocation8]   ;;  %s220_s11 = int_to_ptr.hbm [resolvable:$true] %s219_s11 }
  0x15   : > { %743 = dma.hbm_to_vmem [thread:$0]  (!%p1114_p10), %s220_s11, 4096, %s222_s14, [#allocation6], %s1014_s19, %s1014_s19, %s1015_s20  }
  0x16   : > { %746 = dma.hbm_to_vmem [thread:$0]  (!%p1114_p10), %s235_s18, 32, %s237_s22, [#allocation6]  }
  0x17   : > { %s247_s11 = sshll.u32 %s1017_s10, 4  ;;  %s1252_s13 = smov 128   ;;  %s248_s11 = int_to_ptr.vmem [resolvable:$true] %s247_s11 }
  0x18   : > { %s1253_s14 = smov 8   ;;  %s1135_s16 = sadd.s32 1, %s1011_s27  }
  0x19   : > { %749 = dma.hbm_to_vmem [thread:$0]  (!%p1114_p10), %s246_s9, 4096, %s248_s11, [#allocation9], %s1252_s13, %s1252_s13, %s1253_s14  }
  0x1a   : > { %s29_s17 = ssub.s32 %s1011_s27, %s1135_s16  ;;  %s32_s19 = sadd.s32 1, %s1007_s26 }
  0x1b   : > { %p30_p12 = scmp.eq.s32.totalorder %s29_s17, 0  ;;  %p39_p13 = scmp.ne.s32.totalorder %s1007_s26, %s1003_s25 }
  0x1c   : > { %p40_p0 = scmp.eq.s32.totalorder %s1011_s27, 0  ;;  %p761_p5 = scmp.lt.s32.totalorder %s1011_s27, 2 }
  0x1d   : > { %s1144_s18 = scalar_select %p30_p12, %s1007_s26, %s32_s19  }
  0x1e   : > { %p1148_p3 = por %p195_p2, %p39_p13  ;;  %s270_s15 = sand.u32 1, %s1007_s26  }
  0x1f   : > { %s722_s21 = sshll.u32 %s1011_s27, 4  ;;  %p41_p7 = por %p40_p0, %p39_p13 }
  0x20   : > { %s708_s22 = sshll.u32 %s270_s15, 4  ;;  %s279_s9 = scalar_lea.hbm %s1244_s0, %s722_s21 }
  0x21   : > { %s280_s10 = sshll.u32 %s279_s9, 4  ;;  %s274_s11 = scalar_lea.vmem [#allocation2], %s708_s22  ;;  %s281_s10 = int_to_ptr.hbm [resolvable:$true] %s280_s10 }
  0x22   : > { %s282_s17 = sshll.u32 %s274_s11, 4  ;;  %p1158_p9 = pnand %p761_p5, %p41_p7  ;;  %s283_s17 = int_to_ptr.vmem [resolvable:$true] %s282_s17 }
  0x23   : > { %s271_s13 = scalar_lea.sflag [#allocation3], %s270_s15  ;;  %s907_s14 = sshra.s32 %s281_s10, 4  ;;  %s908_s14 = int_to_ptr.hbm [resolvable:$true] %s907_s14 }
  0x24   : > { %s909_s1 = scalar_lea.hbm %s908_s14, 16  ;;  %p911_p10 = pneg %p1158_p9 }
  0x25   : > { %p910_p2 = scmp.ne.s32.totalorder %s908_s14, %s909_s1  ;;  %s914_s22 = scalar_lea.hbm %s1244_s0, 32 }
  0x26   : > { %p915_p0 = scmp.lt.s32.totalorder %s908_s14, %s1244_s0  ;;  %p916_p5 = scmp.lt.s32.totalorder %s914_s22, %s909_s1 }
  0x27   : > { %p912_p12 = pnand %p911_p10, %p910_p2 }
  0x28   : > { %p917_p7 = por %p916_p5, %p915_p0 }
  0x29   : > { %p913_p13 = pneg %p912_p12 }
  0x2b   : > { %p918_p11 = pnand %p917_p7, %p913_p13 }
  0x2d   : > { %921 = shalt.err (!%p918_p11)
}
  0x2e   : > { %s1262_s15 = smov 8   ;;  %s1263_s11 = smov 128  }
  0x2f   : > { %753 = dma.hbm_to_vmem [thread:$0]  (!%p1158_p9), %s281_s10, 256, %s283_s17, %s271_s13, %s1263_s11, %s1263_s11, %s1262_s15  }
  0x30   : > { %294 = sbr.rel (%p1106_p8) target bundleno = 636 (0x27c), region = 48  ;;  %s1178_s21 = sand.u32 (!%p1106_p8), 1, %s1003_s25  }
  0x31   : > { %s712_s1 = sshll.u32 (!%p1106_p8), %s1178_s21, 4  ;;  %s297_s14 = scalar_lea.sflag (!%p1106_p8), [#allocation3], %s1178_s21 }
  0x32   : > { %s1184_s23 = scalar_lea.vmem (!%p1106_p8), [#allocation2], %s712_s1 }
  0x35   : > { %982 = dma.done.wait (%p1093_p4), %s297_s14, 256  }
  0x36   : > { %984 = vsyncadd (%p1093_p4), %s297_s14, 4294967040 }
  0x37   : > { %986 = dma.done.wait (%p46_p1), [#allocation6], 4128  }
  0x38   : > { %988 = vsyncadd (%p46_p1), [#allocation6], 4294963168 }
  0x39   : > { %990 = dma.done.wait (%p46_p1), [#allocation9], 4096  }
  0x3a   : > { %992 = vsyncadd (%p46_p1), [#allocation9], 4294963200  ;;  %v383_v0 = vld [vmem:[#allocation5 + $0xf0] sm:$0xff]  ;;  %v381_v1 = vld [vmem:[#allocation5 + $0xe0] sm:$0xff]  ;;  %s723_s22 = sshll.u32 %s1084_s28, 4  ;;  %s346_s11 = scalar_lea.vmem [#allocation10], %s712_s1 }
  0x3b   : > { %v384_v2 = vld [vmem:[#allocation5 + $0xf8] sm:$0xff]  ;;  %391 = vmatpush.msra.mxu0 %v383_v0  ;;  %v382_v3 = vld [vmem:[#allocation5 + $0xe8] sm:$0xff]  ;;  %v379_v4 = vld [vmem:[#allocation5 + $0xd0] sm:$0xff]  ;;  %s596_s15 = scalar_lea.hbm %s1251_s7, %s723_s22  ;;  %s597_s14 = sshll.u32 %s346_s11, 4  ;;  %s598_s14 = int_to_ptr.vmem [resolvable:$true] %s597_s14 }
  0x3c   : > { %414 = vmatpush.msra.mxu1 %v384_v2  ;;  %v380_v5 = vld [vmem:[#allocation5 + $0xd8] sm:$0xff]  ;;  %v377_v6 = vld [vmem:[#allocation5 + $0xc0] sm:$0xff]  ;;  %v378_v7 = vld [vmem:[#allocation5 + $0xc8] sm:$0xff]  ;;  %s585_s28 = scalar_lea.sflag [#allocation4], %s1178_s21  ;;  %s957_s10 = scalar_lea.hbm %s1251_s7, 32 }
  0x3d   : > { %392 = vmatpush.msra.mxu0 %v381_v1  ;;  %v375_v8 = vld [vmem:[#allocation5 + $0xb0] sm:$0xff]  ;;  %v376_v9 = vld [vmem:[#allocation5 + $0xb8] sm:$0xff]  ;;  %v373_v10 = vld [vmem:[#allocation5 + $0xa0] sm:$0xff] }
  0x3e   : > { %415 = vmatpush.msra.mxu1 %v382_v3  ;;  %v374_v11 = vld [vmem:[#allocation5 + $0xa8] sm:$0xff]  ;;  %v371_v12 = vld [vmem:[#allocation5 + $0x90] sm:$0xff]  ;;  %v372_v13 = vld [vmem:[#allocation5 + $0x98] sm:$0xff] }
  0x3f   : > { %393 = vmatpush.msra.mxu0 %v379_v4  ;;  %v456_v14 = vld [vmem:[#allocation8 + $0x78] sm:$0xff]  ;;  %v455_v15 = vld [vmem:[#allocation8 + $0x70] sm:$0xff]  ;;  %v370_v17 = vld [vmem:[#allocation5 + $0x88] sm:$0xff] }
  0x40   : > { %416 = vmatpush.msra.mxu1 %v380_v5  ;;  %v369_v16 = vld [vmem:[#allocation5 + $0x80] sm:$0xff]  ;;  %477 = vmatpush.msra.mxu2 %v456_v14  ;;  %v454_v19 = vld [vmem:[#allocation8 + $0x68] sm:$0xff]  ;;  %v471_v20 = vld [vmem:[#allocation8 + $0xf0] sm:$0xff] }
  0x41   : > { %394 = vmatpush.msra.mxu0 %v377_v6  ;;  %v472_v18 = vld [vmem:[#allocation8 + $0xf8] sm:$0xff]  ;;  %v367_v21 = vld [vmem:[#allocation5 + $0x70] sm:$0xff]  ;;  %v453_v23 = vld [vmem:[#allocation8 + $0x60] sm:$0xff] }
  0x42   : > { %417 = vmatpush.msra.mxu1 %v378_v7  ;;  %v368_v22 = vld [vmem:[#allocation5 + $0x78] sm:$0xff]  ;;  %478 = vmatpush.msra.mxu2 %v455_v15  ;;  %v470_v24 = vld [vmem:[#allocation8 + $0xe8] sm:$0xff]  ;;  %v365_v25 = vld [vmem:[#allocation5 + $0x60] sm:$0xff] }
  0x43   : > { %395 = vmatpush.msra.mxu0 %v375_v8  ;;  %500 = vmatpush.msra.mxu3 %v472_v18  ;;  %v366_v26 = vld [vmem:[#allocation5 + $0x68] sm:$0xff]  ;;  %v452_v27 = vld [vmem:[#allocation8 + $0x58] sm:$0xff]  ;;  %v363_v29 = vld [vmem:[#allocation5 + $0x50] sm:$0xff] }
  0x44   : > { %418 = vmatpush.msra.mxu1 %v376_v9  ;;  %479 = vmatpush.msra.mxu2 %v454_v19  ;;  %v469_v28 = vld [vmem:[#allocation8 + $0xe0] sm:$0xff]  ;;  %v364_v30 = vld [vmem:[#allocation5 + $0x58] sm:$0xff]  ;;  %v450_v35 = vld [vmem:[#allocation8 + $0x48] sm:$0xff] }
  0x45   : > { %396 = vmatpush.msra.mxu0 %v373_v10  ;;  %501 = vmatpush.msra.mxu3 %v471_v20  ;;  %v361_v31 = vld [vmem:[#allocation5 + $0x40] sm:$0xff]  ;;  %v451_v32 = vld [vmem:[#allocation8 + $0x50] sm:$0xff]  ;;  %v362_v34 = vld [vmem:[#allocation5 + $0x48] sm:$0xff] }
  0x46   : > { %419 = vmatpush.msra.mxu1 %v374_v11  ;;  %480 = vmatpush.msra.mxu2 %v453_v23  ;;  %v468_v33 = vld [vmem:[#allocation8 + $0xd8] sm:$0xff]  ;;  %v467_v36 = vld [vmem:[#allocation8 + $0xd0] sm:$0xff]  ;;  %v449_v39 = vld [vmem:[#allocation8 + $0x40] sm:$0xff] }
  0x47   : > { %397 = vmatpush.msra.mxu0 %v371_v12  ;;  %502 = vmatpush.msra.mxu3 %v470_v24  ;;  %v359_v37 = vld [vmem:[#allocation5 + $0x30] sm:$0xff]  ;;  %v360_v38 = vld [vmem:[#allocation5 + $0x38] sm:$0xff]  ;;  %v357_v41 = vld [vmem:[#allocation5 + $0x20] sm:$0xff] }
  0x48   : > { %420 = vmatpush.msra.mxu1 %v372_v13  ;;  %481 = vmatpush.msra.mxu2 %v452_v27  ;;  %v466_v40 = vld [vmem:[#allocation8 + $0xc8] sm:$0xff]  ;;  %v448_v43 = vld [vmem:[#allocation8 + $0x38] sm:$0xff]  ;;  %v465_v44 = vld [vmem:[#allocation8 + $0xc0] sm:$0xff] }
  0x49   : > { %398 = vmatpush.msra.mxu0 %v369_v16  ;;  %503 = vmatpush.msra.mxu3 %v469_v28  ;;  %v358_v42 = vld [vmem:[#allocation5 + $0x28] sm:$0xff]  ;;  %v355_v45 = vld [vmem:[#allocation5 + $0x10] sm:$0xff]  ;;  %v356_v46 = vld [vmem:[#allocation5 + $0x18] sm:$0xff]  ;;  %v1020_v28 = vmov 128.0  }
  0x4a   : > { %421 = vmatpush.msra.mxu1 %v370_v17  ;;  %482 = vmatpush.msra.mxu2 %v451_v32  ;;  %v447_v47 = vld [vmem:[#allocation8 + $0x30] sm:$0xff]  ;;  %v464_v48 = vld [vmem:[#allocation8 + $0xb8] sm:$0xff]  ;;  %v354_v50 = vld [vmem:[#allocation5 + $0x8] sm:$0xff]  ;;  %811 = vrcp.f32 %v1020_v28 }
  0x4b   : > { %399 = vmatpush.msra.mxu0 %v367_v21  ;;  %504 = vmatpush.msra.mxu3 %v468_v33  ;;  %v353_v49 = vld [vmem:[#allocation5] sm:$0xff]  ;;  %v446_v52 = vld [vmem:[#allocation8 + $0x28] sm:$0xff]  ;;  %v463_v53 = vld [vmem:[#allocation8 + $0xb0] sm:$0xff] }
  0x4c   : > { %422 = vmatpush.msra.mxu1 %v368_v22  ;;  %483 = vmatpush.msra.mxu2 %v450_v35  ;;  %v349_v51 = vld [vmem:[%s1184_s23] sm:$0xff]  ;;  %v350_v58 = vld [vmem:[%s1184_s23 + $0x8] sm:$0xff]  ;;  %s599_s23 = sshll.u32 %s596_s15, 4  ;;  %s600_s23 = int_to_ptr.hbm [resolvable:$true] %s599_s23 }
  0x4d   : > { %400 = vmatpush.msra.mxu0 %v365_v25  ;;  %505 = vmatpush.msra.mxu3 %v467_v36  ;;  %v445_v54 = vld [vmem:[#allocation8 + $0x20] sm:$0xff]  ;;  %v462_v55 = vld [vmem:[#allocation8 + $0xa8] sm:$0xff]  ;;  %v444_v56 = vld [vmem:[#allocation8 + $0x18] sm:$0xff]  ;;  %s951_s30 = sshra.s32 %s600_s23, 4  ;;  %s952_s30 = int_to_ptr.hbm [resolvable:$true] %s951_s30 }
  0x4e   : > { %423 = vmatpush.msra.mxu1 %v366_v26  ;;  %484 = vmatpush.msra.mxu2 %v449_v39  ;;  %v461_v57 = vld [vmem:[#allocation8 + $0xa0] sm:$0xff]  ;;  %v443_v59 = vld [vmem:[#allocation8 + $0x10] sm:$0xff]  ;;  %v460_v60 = vld [vmem:[#allocation8 + $0x98] sm:$0xff]  ;;  %s953_s12 = scalar_lea.hbm %s952_s30, 16  ;;  %p958_p11 = scmp.lt.s32.totalorder %s952_s30, %s1251_s7 }
  0x4f   : > { %401 = vmatpush.msra.mxu0 %v363_v29  ;;  %506 = vmatpush.msra.mxu3 %v466_v40  ;;  %v442_v61 = vld [vmem:[#allocation8 + $0x8] sm:$0xff]  ;;  %v459_v62 = vld [vmem:[#allocation8 + $0x90] sm:$0xff]  ;;  %v441_v63 = vld [vmem:[#allocation8] sm:$0xff]  ;;  %p954_p1 = scmp.ne.s32.totalorder %s952_s30, %s953_s12  ;;  %p959_p9 = scmp.lt.s32.totalorder %s957_s10, %s953_s12 }
  0x50   : > { %424 = vmatpush.msra.mxu1 %v364_v30  ;;  %485 = vmatpush.msra.mxu2 %v448_v43  ;;  %v458_v0 = vld [vmem:[#allocation8 + $0x88] sm:$0xff]  ;;  %v457_v1 = vld [vmem:[#allocation8 + $0x80] sm:$0xff]  ;;  %v385_v2 = vld [vmem:[#allocation7] sm:$0x3]  ;;  %v812_v29 = vpop.eup %811 }
  0x51   : > { %402 = vmatpush.msra.mxu0 %v361_v31  ;;  %507 = vmatpush.msra.mxu3 %v465_v44  ;;  %v387_v3 = vperm.slane %v385_v2, 0  ;;  %v388_v4 = vperm.slane %v385_v2, 1  ;;  %v808_v17 = vld [vmem:[%s1248_s4] ss:$0 sm:$0xff]  ;;  %v530_v30 = vmul.f32 128.0, %v812_v29  ;;  %vm534_vm0 = vweird.f32 %v812_v29  ;;  %p955_p4 = pnand %p954_p1, %p1148_p3  ;;  %p960_p2 = por %p959_p9, %p958_p11 }
  0x52   : > { %425 = vmatpush.msra.mxu1 %v362_v34  ;;  %486 = vmatpush.msra.mxu2 %v447_v47 }
  0x53   : > { %403 = vmatpush.msra.mxu0 %v359_v37  ;;  %508 = vmatpush.msra.mxu3 %v464_v48  ;;  %v531_v31 = vsub.f32 1.0, %v530_v30  ;;  %p956_p8 = pneg %p955_p4 }
  0x54   : > { %426 = vmatpush.msra.mxu1 %v360_v38  ;;  %487 = vmatpush.msra.mxu2 %v446_v52 }
  0x55   : > { %404 = vmatpush.msra.mxu0 %v357_v41  ;;  %509 = vmatpush.msra.mxu3 %v463_v53  ;;  %v532_v32 = vmul.f32 %v812_v29, %v531_v31  ;;  %p961_p10 = pnand %p960_p2, %p956_p8 }
  0x56   : > { %427 = vmatpush.msra.mxu1 %v358_v42  ;;  %488 = vmatpush.msra.mxu2 %v445_v54 }
  0x57   : > { %405 = vmatpush.msra.mxu0 %v355_v45  ;;  %510 = vmatpush.msra.mxu3 %v462_v55  ;;  %v533_v33 = vadd.f32 %v812_v29, %v532_v32 }
  0x58   : > { %428 = vmatpush.msra.mxu1 %v356_v46  ;;  %489 = vmatpush.msra.mxu2 %v444_v56 }
  0x59   : > { %406 = vmatpush.msra.mxu0 %v353_v49  ;;  %511 = vmatpush.msra.mxu3 %v461_v57  ;;  %v535_v34 = vsel %vm534_vm0, %v812_v29, %v533_v33  ;;  %v809_v57 = vld [vmem:[%s1249_s5] ss:$0 sm:$0xff] }
  0x5a   : > { %429 = vmatpush.msra.mxu1 %v354_v50  ;;  %407 = vmatmul.f32.vlgmr.msra.gmra.mxu0 %v349_v51 }
  0x5b   : > { %430 = vmatmul.f32.vlgmr.msra.gmra.mxu1 %v349_v51  ;;  %490 = vmatpush.msra.mxu2 %v443_v59 }
  0x5c   : > { %512 = vmatpush.msra.mxu3 %v460_v60  ;;  %v810_v60 = vld [vmem:[%s1250_s6] ss:$0 sm:$0xff] }
  0x5d   : > { %491 = vmatpush.msra.mxu2 %v442_v61 }
  0x5e   : > { %513 = vmatpush.msra.mxu3 %v459_v62 }
  0x5f   : > { %492 = vmatpush.msra.mxu2 %v441_v63 }
  0x60   : > { %514 = vmatpush.msra.mxu3 %v458_v0 }
  0x62   : > { %410 = vmatmul.f32.gmra.mxu0 %v350_v58  ;;  %515 = vmatpush.msra.mxu3 %v457_v1 }
  0x63   : > { %433 = vmatmul.f32.gmra.mxu1 %v350_v58 }
  0xd7   : > { %v408_v5 = vpop.f32.mrf.mxu0 }
  0xd8   : > { %v431_v6 = vpop.f32.mrf.mxu1  ;;  %v409_v7 = vadd.f32 %v408_v5, %v387_v3 }
  0xd9   : > { %v432_v8 = vadd.f32 %v431_v6, %v388_v4 }
  0xda   : > { %v437_v9 = vmax.f32 %v409_v7, 0.0 }
  0xdb   : > { %v438_v10 = vmax.f32 %v432_v8, 0.0 }
  0xdc   : > { %493 = vmatmul.f32.vlgmr.msra.gmra.mxu2 %v437_v9 }
  0xdd   : > { %516 = vmatmul.f32.vlgmr.msra.gmra.mxu3 %v438_v10 }
  0xdf   : > { %v411_v11 = vpop.f32.mrf.mxu0 }
  0xe0   : > { %v434_v12 = vpop.f32.mrf.mxu1  ;;  %v412_v13 = vadd.f32 %v411_v11, %v387_v3 }
  0xe1   : > { %v435_v14 = vadd.f32 %v434_v12, %v388_v4 }
  0xe2   : > { %v439_v15 = vmax.f32 %v412_v13, 0.0 }
  0xe3   : > { %v440_v16 = vmax.f32 %v435_v14, 0.0 }
  0xe4   : > { %496 = vmatmul.f32.gmra.mxu2 %v439_v15 }
  0xe5   : > { %519 = vmatmul.f32.gmra.mxu3 %v440_v16 }
 0x15f   : > { %v494_v18 = vpop.f32.mrf.mxu2 }
 0x160   : > { %v517_v19 = vpop.f32.mrf.mxu3  ;;  %v495_v20 = vadd.f32 %v808_v17, %v494_v18 }
 0x162   : > { %v518_v21 = vadd.f32 %v517_v19, %v495_v20 }
 0x164   : > { %v523_v22 = vadd.f32 %v518_v21, %v349_v51 }
 0x166   : > { %525 = vadd.xlane.f32.xlu0 %v523_v22 }
 0x167   : > { %v497_v23 = vpop.f32.mrf.mxu2 }
 0x168   : > { %v520_v24 = vpop.f32.mrf.mxu3  ;;  %v498_v25 = vadd.f32 %v808_v17, %v497_v23 }
 0x16a   : > { %v521_v26 = vadd.f32 %v520_v24, %v498_v25 }
 0x16c   : > { %v524_v27 = vadd.f32 %v521_v26, %v350_v58 }
 0x16e   : > { %527 = vadd.xlane.f32.xlu0 %v524_v27 }
 0x1d9   : > { %v526_v35 = vpop.xlane.xlu0 %525 }
 0x1da   : > { %v536_v36 = vmul.f32 %v535_v34, %v526_v35 }
 0x1dc   : > { %v538_v37 = vsub.f32 %v523_v22, %v536_v36 }
 0x1de   : > { %v540_v38 = vmul.f32 %v538_v37, %v538_v37 }
 0x1e0   : > { %542 = vadd.xlane.f32.xlu1 %v540_v38 }
 0x1e1   : > { %v528_v39 = vpop.xlane.xlu0 %527 }
 0x1e2   : > { %v537_v40 = vmul.f32 %v535_v34, %v528_v39 }
 0x1e4   : > { %v539_v41 = vsub.f32 %v524_v27, %v537_v40 }
 0x1e6   : > { %v541_v42 = vmul.f32 %v539_v41, %v539_v41 }
 0x1e8   : > { %544 = vadd.xlane.f32.xlu1 %v541_v42 }
 0x253   : > { %v543_v43 = vpop.xlane.xlu1 %542 }
 0x254   : > { %v546_v44 = vmul.f32 %v543_v43, %v535_v34 }
 0x256   : > { %v548_v45 = vadd.f32 1e-05, %v546_v44 }
 0x258   : > { %813 = vrsqrt.f32 %v548_v45  ;;  %vm556_vm2 = vweird.f32 %v548_v45 }
 0x25b   : > { %v545_v46 = vpop.xlane.xlu1 %544 }
 0x25c   : > { %v547_v47 = vmul.f32 %v545_v46, %v535_v34 }
 0x25e   : > { %v814_v48 = vpop.eup %813  ;;  %v549_v49 = vadd.f32 1e-05, %v547_v47 }
 0x25f   : > { %v551_v50 = vmul.f32 %v814_v48, %v548_v45  ;;  %vm557_vm1 = vweird.f32 %v814_v48 }
 0x260   : > { %815 = vrsqrt.f32 %v549_v49  ;;  %vm558_vm3 = vmor %vm556_vm2, %vm557_vm1  ;;  %vm566_vm5 = vweird.f32 %v549_v49 }
 0x261   : > { %v552_v51 = vmul.f32 %v814_v48, %v551_v50 }
 0x263   : > { %v553_v52 = vmul.f32 0.5, %v552_v51 }
 0x265   : > { %v554_v53 = vsub.f32 1.5, %v553_v52 }
 0x266   : > { %v816_v54 = vpop.eup %815 }
 0x267   : > { %v555_v55 = vmul.f32 %v814_v48, %v554_v53  ;;  %v561_v56 = vmul.f32 %v816_v54, %v549_v49  ;;  %vm567_vm4 = vweird.f32 %v816_v54 }
 0x268   : > { %vm568_vm6 = vmor %vm566_vm5, %vm567_vm4 }
 0x269   : > { %v559_v58 = vsel %vm558_vm3, %v814_v48, %v555_v55  ;;  %v562_v59 = vmul.f32 %v816_v54, %v561_v56 }
 0x26a   : > { %v570_v61 = vmul.f32 %v559_v58, %v538_v37 }
 0x26b   : > { %v563_v62 = vmul.f32 0.5, %v562_v59 }
 0x26c   : > { %v575_v63 = vmul.f32 %v809_v57, %v570_v61 }
 0x26d   : > { %v564_v0 = vsub.f32 1.5, %v563_v62 }
 0x26e   : > { %v580_v1 = vadd.f32 %v810_v60, %v575_v63 }
 0x26f   : > { %v565_v2 = vmul.f32 %v816_v54, %v564_v0 }
 0x270   : > { %582 = vst [vmem:[%s346_s11] sm:$0xff] %v580_v1 }
 0x271   : > { %v569_v3 = vsel %vm568_vm6, %v816_v54, %v565_v2 }
 0x272   : > { %v571_v4 = vmul.f32 %v569_v3, %v539_v41 }
 0x274   : > { %v576_v5 = vmul.f32 %v809_v57, %v571_v4 }
 0x276   : > { %v581_v6 = vadd.f32 %v810_v60, %v576_v5 }
 0x278   : > { %583 = vst [vmem:[%s346_s11 + $0x8] sm:$0xff] %v581_v6 }
 0x279   : > { %964 = shalt.err (!%p961_p10)
}
 0x27a   : > { %s1021_s21 = smov 128   ;;  %s1022_s22 = smov 8  }
 0x27b   : > { %738 = dma.vmem_to_hbm [thread:$0]  (%p1148_p3), %s598_s14, 256, %s600_s23, %s585_s28, %s1021_s21, %s1021_s21, %s1022_s22  }
 0x27c PF: > { %s614_s29 = sand.u32 1, %s999_s24   ;;  %p1264_p12 = scmp.ge.s32.totalorder %s1011_s27, 2 }
 0x27d   : > { %s615_s9 = scalar_lea.sflag [#allocation4], %s614_s29 }
 0x27e   : > { %p755_p13 = pnand %p1264_p12, %p1098_p6 }
 0x280   : > { %p756_p0 = pneg %p755_p13 }
 0x282   : > { %994 = dma.done.wait (%p756_p0), %s615_s9, 256  }
 0x283   : > { %996 = vsyncadd (%p756_p0), %s615_s9, 4294967040  ;;  %p22_p5 = scmp.ge.s32.totalorder %s1135_s16, 4   ;;  %s1265_s24 = smov %s1003_s25 }
 0x284   : > { %s1266_s25 = smov %s1007_s26  ;;  %s1267_s26 = smov %s1144_s18 }
 0x285   : > { %s1268_s27 = smov %s1135_s16  ;;  %24 = sbr.rel (!%p22_p5) target bundleno = 9 (0x9), region = 105 }
 0x28a   :  { %621 = vsyncpa [#allocation3], 1 }
 0x28b   :  { %623 = vsyncpa [#allocation3 + $0x1], 1 }
 0x28c   :  { %624 = vsyncpa [#allocation6], 1 }
 0x28d   :  { %625 = vsyncpa [#allocation9], 1 }
 0x28e   :  { %626 = vsyncpa [#allocation4], 1 }
 0x28f   :  { %628 = vsyncpa [#allocation4 + $0x1], 1 }

</bundles_post_ra>
